<compile_context>
chip_gen: v7x
topology: tpu7x:2x2x1
jax: 0.10.0
libtpu: 0.0.40
codegen_flags: <defaults>
</compile_context>

<pallas_src>
import functools

import jax
import jax.numpy as jnp
from jax import lax
from jax.experimental import pallas as pl
from jax.experimental.pallas import tpu as pltpu

BN_EPS = 1e-5
NUM_LABELS = 2
OUT_PAD = 128  # logits padded 2 -> 128 for lane-dense stores


# ---------------------------------------------------------------------------
# In-kernel helpers
# ---------------------------------------------------------------------------
def _bn_relu(h, gamma, beta, inv_n):
    """Training-mode BatchNorm1d + ReLU, single reduction pass.

    sum & sum-of-squares once; var = E[h^2] - mean^2; fold gamma*rsqrt(var+eps)
    and (beta - mean*scale) so the normalize step is one multiply-add.
    """
    s = jnp.sum(h, axis=0, keepdims=True)
    sq = jnp.sum(h * h, axis=0, keepdims=True)
    mean = s * inv_n
    var = jnp.maximum(sq * inv_n - mean * mean, 0.0)
    scale = gamma * lax.rsqrt(var + BN_EPS)
    shift = beta - mean * scale
    return jnp.maximum(h * scale + shift, 0.0)


def _mlp2_kernel(x_ref, w1_ref, b1_ref, g1_ref, be1_ref, w2_ref, b2_ref,
                 o_ref, *, inv_n):
    """fc1 -> bn1 -> relu -> fc2  (small / large branches)."""
    x = x_ref[...]  # bf16
    h = jnp.dot(x, w1_ref[...], preferred_element_type=jnp.float32) + b1_ref[...]
    h = _bn_relu(h, g1_ref[...], be1_ref[...], inv_n)
    o_ref[...] = (jnp.dot(h.astype(jnp.bfloat16), w2_ref[...],
                          preferred_element_type=jnp.float32) + b2_ref[...])


def _mlp3_kernel(x_ref, w1_ref, b1_ref, g1_ref, be1_ref,
                 w2_ref, b2_ref, g2_ref, be2_ref,
                 w3_ref, b3_ref, o_ref, *, inv_n):
    """fc1_large -> bn1_large -> relu -> fc2_medium -> bn2_medium -> relu -> fc3_medium."""
    x = x_ref[...]  # bf16
    h = jnp.dot(x, w1_ref[...], preferred_element_type=jnp.float32) + b1_ref[...]
    h = _bn_relu(h, g1_ref[...], be1_ref[...], inv_n)
    h = (jnp.dot(h.astype(jnp.bfloat16), w2_ref[...],
                 preferred_element_type=jnp.float32) + b2_ref[...])
    h = _bn_relu(h, g2_ref[...], be2_ref[...], inv_n)
    o_ref[...] = (jnp.dot(h.astype(jnp.bfloat16), w3_ref[...],
                          preferred_element_type=jnp.float32) + b3_ref[...])


def _fused_kernel(x_ref,
                  w1s_ref, b1s_ref, g1s_ref, be1s_ref, w2s_ref, b2s_ref,
                  w1l_ref, b1l_ref, g1l_ref, be1l_ref, w2l_ref, b2l_ref,
                  w2m_ref, b2m_ref, g2m_ref, be2m_ref, w3m_ref, b3m_ref,
                  o_small_ref, o_large_ref, o_diag_ref, *, inv_n):
    """All three branch types for one x in a single dispatch.

    The fc1_large/bn1_large/relu trunk is computed once and reused by both the
    'lab/treatment' head and the 'diagnosis' continuation.
    """
    x = x_ref[...]  # bf16
    # --- small branch (demographics / medication / aps) ---
    hs = jnp.dot(x, w1s_ref[...], preferred_element_type=jnp.float32) + b1s_ref[...]
    hs = _bn_relu(hs, g1s_ref[...], be1s_ref[...], inv_n)
    o_small_ref[...] = (jnp.dot(hs.astype(jnp.bfloat16), w2s_ref[...],
                                preferred_element_type=jnp.float32) + b2s_ref[...])
    # --- shared large trunk ---
    hl = jnp.dot(x, w1l_ref[...], preferred_element_type=jnp.float32) + b1l_ref[...]
    hl = _bn_relu(hl, g1l_ref[...], be1l_ref[...], inv_n)
    hl16 = hl.astype(jnp.bfloat16)
    # lab / treatment head
    o_large_ref[...] = (jnp.dot(hl16, w2l_ref[...],
                                preferred_element_type=jnp.float32) + b2l_ref[...])
    # diagnosis continuation
    hm = (jnp.dot(hl16, w2m_ref[...],
                  preferred_element_type=jnp.float32) + b2m_ref[...])
    hm = _bn_relu(hm, g2m_ref[...], be2m_ref[...], inv_n)
    o_diag_ref[...] = (jnp.dot(hm.astype(jnp.bfloat16), w3m_ref[...],
                               preferred_element_type=jnp.float32) + b3m_ref[...])


# ---------------------------------------------------------------------------
# pallas_call wrappers
# ---------------------------------------------------------------------------
def _vmem_spec():
    return pl.BlockSpec(memory_space=pltpu.MemorySpace.VMEM)


def _cost(args, out_bytes, flops, transcendentals):
    bytes_accessed = sum(int(a.size) * a.dtype.itemsize for a in args) + out_bytes
    return pl.CostEstimate(flops=flops, transcendentals=transcendentals,
                           bytes_accessed=bytes_accessed)


def _call(kernel, args, batch, flops, transcendentals):
    # Tiny problem: single grid point, everything resident in VMEM.
    out_shape = jax.ShapeDtypeStruct((batch, OUT_PAD), jnp.float32)
    return pl.pallas_call(
        kernel,
        out_shape=out_shape,
        in_specs=[_vmem_spec() for _ in args],
        out_specs=_vmem_spec(),
        cost_estimate=_cost(args, batch * OUT_PAD * 4, flops, transcendentals),
    )(*args)


# ---------------------------------------------------------------------------
# Parameter construction (mirrors UnimodalFramework.__init__)
# ---------------------------------------------------------------------------
def _linear_params(key, in_dim, out_dim, pad_to=None):
    kw, kb = jax.random.split(key)
    bound = 1.0 / (in_dim ** 0.5)
    # stored already transposed: [in, out]
    w = jax.random.uniform(kw, (in_dim, out_dim), jnp.float32, -bound, bound)
    b = jax.random.uniform(kb, (1, out_dim), jnp.float32, -bound, bound)
    if pad_to is not None and pad_to > out_dim:
        w = jnp.pad(w, ((0, 0), (0, pad_to - out_dim)))
        b = jnp.pad(b, ((0, 0), (0, pad_to - out_dim)))
    return w.astype(jnp.bfloat16), b  # weights bf16, bias f32


def _bn_params(dim):
    # PyTorch default init: gamma=1, beta=0
    return jnp.ones((1, dim), jnp.float32), jnp.zeros((1, dim), jnp.float32)


def init_params(feature_dim, key):
    keys = jax.random.split(key, 6)
    p = {}
    p["fc1_small"] = _linear_params(keys[0], feature_dim, 128)
    p["fc1_large"] = _linear_params(keys[1], feature_dim, 256)
    p["fc2_small"] = _linear_params(keys[2], 128, NUM_LABELS, pad_to=OUT_PAD)
    p["fc2_medium"] = _linear_params(keys[3], 256, 128)
    p["fc2_large"] = _linear_params(keys[4], 256, NUM_LABELS, pad_to=OUT_PAD)
    p["fc3_medium"] = _linear_params(keys[5], 128, NUM_LABELS, pad_to=OUT_PAD)
    p["bn1_small"] = _bn_params(128)
    p["bn1_large"] = _bn_params(256)
    p["bn2_medium"] = _bn_params(128)
    return p


# ---------------------------------------------------------------------------
# Forward (dispatch on modality, like the PyTorch module)
# ---------------------------------------------------------------------------
def unimodal_forward(params, x, modality_name):
    b = x.shape[0]
    x16 = x.astype(jnp.bfloat16)
    if modality_name in ("demographics", "medication", "aps"):
        w1, b1 = params["fc1_small"]
        g1, be1 = params["bn1_small"]
        w2, b2 = params["fc2_small"]
        args = (x16, w1, b1, g1, be1, w2, b2)
        kernel = functools.partial(_mlp2_kernel, inv_n=1.0 / b)
        flops = 2 * b * (w1.shape[0] * w1.shape[1] + w2.shape[0] * w2.shape[1])
        transc = g1.shape[1]
    elif modality_name in ("lab", "treatment"):
        w1, b1 = params["fc1_large"]
        g1, be1 = params["bn1_large"]
        w2, b2 = params["fc2_large"]
        args = (x16, w1, b1, g1, be1, w2, b2)
        kernel = functools.partial(_mlp2_kernel, inv_n=1.0 / b)
        flops = 2 * b * (w1.shape[0] * w1.shape[1] + w2.shape[0] * w2.shape[1])
        transc = g1.shape[1]
    elif modality_name == "diagnosis":
        w1, b1 = params["fc1_large"]
        g1, be1 = params["bn1_large"]
        w2, b2 = params["fc2_medium"]
        g2, be2 = params["bn2_medium"]
        w3, b3 = params["fc3_medium"]
        args = (x16, w1, b1, g1, be1, w2, b2, g2, be2, w3, b3)
        kernel = functools.partial(_mlp3_kernel, inv_n=1.0 / b)
        flops = 2 * b * (w1.shape[0] * w1.shape[1] + w2.shape[0] * w2.shape[1]
                         + w3.shape[0] * w3.shape[1])
        transc = g1.shape[1] + g2.shape[1]
    else:
        raise ValueError(f"Unknown modality: {modality_name}")
    out = _call(kernel, args, b, flops, transc)
    return out[:, :NUM_LABELS]


def unimodal_forward_fused(params, x):
    """All three branch types for one x in a single pallas_call (amortizes the
    per-call dispatch/pipeline overhead, which dominates at these sizes)."""
    b = x.shape[0]
    x16 = x.astype(jnp.bfloat16)
    w1s, b1s = params["fc1_small"]
    g1s, be1s = params["bn1_small"]
    w2s, b2s = params["fc2_small"]
    w1l, b1l = params["fc1_large"]
    g1l, be1l = params["bn1_large"]
    w2l, b2l = params["fc2_large"]
    w2m, b2m = params["fc2_medium"]
    g2m, be2m = params["bn2_medium"]
    w3m, b3m = params["fc3_medium"]
    args = (x16,
            w1s, b1s, g1s, be1s, w2s, b2s,
            w1l, b1l, g1l, be1l, w2l, b2l,
            w2m, b2m, g2m, be2m, w3m, b3m)
    flops = 2 * b * sum(w.shape[0] * w.shape[1]
                        for w in (w1s, w2s, w1l, w2l, w2m, w3m))
    transc = g1s.shape[1] + g1l.shape[1] + g2m.shape[1]
    out_shapes = tuple(jax.ShapeDtypeStruct((b, OUT_PAD), jnp.float32)
                       for _ in range(3))
    small, large, diag = pl.pallas_call(
        functools.partial(_fused_kernel, inv_n=1.0 / b),
        out_shape=out_shapes,
        in_specs=[_vmem_spec() for _ in args],
        out_specs=tuple(_vmem_spec() for _ in range(3)),
        cost_estimate=_cost(args, 3 * b * OUT_PAD * 4, flops, transc),
    )(*args)
    return {"small": small[:, :NUM_LABELS],
            "large": large[:, :NUM_LABELS],
            "diagnosis": diag[:, :NUM_LABELS]}


# ---------------------------------------------------------------------------
# Pure-JAX reference (same bf16 quantization points as the kernel)
# ---------------------------------------------------------------------------
def _ref_bn_relu(h, g, b):
    m = jnp.mean(h, axis=0, keepdims=True)
    v = jnp.mean((h - m) ** 2, axis=0, keepdims=True)
    return jnp.maximum((h - m) * lax.rsqrt(v + BN_EPS) * g + b, 0.0)


def _ref_dot(a, w, b):
    return jnp.dot(a.astype(jnp.bfloat16), w,
                   preferred_element_type=jnp.float32) + b


def reference_forward(params, x, modality_name):
    if modality_name in ("demographics", "medication", "aps"):
        w1, b1 = params["fc1_small"]; g1, be1 = params["bn1_small"]
        w2, b2 = params["fc2_small"]
        h = _ref_bn_relu(_ref_dot(x, w1, b1), g1, be1)
        out = _ref_dot(h, w2, b2)
    elif modality_name in ("lab", "treatment"):
        w1, b1 = params["fc1_large"]; g1, be1 = params["bn1_large"]
        w2, b2 = params["fc2_large"]
        h = _ref_bn_relu(_ref_dot(x, w1, b1), g1, be1)
        out = _ref_dot(h, w2, b2)
    else:  # diagnosis
        w1, b1 = params["fc1_large"]; g1, be1 = params["bn1_large"]
        w2, b2 = params["fc2_medium"]; g2, be2 = params["bn2_medium"]
        w3, b3 = params["fc3_medium"]
        h = _ref_bn_relu(_ref_dot(x, w1, b1), g1, be1)
        h = _ref_bn_relu(_ref_dot(h, w2, b2), g2, be2)
        out = _ref_dot(h, w3, b3)
    return out[:, :NUM_LABELS]


if __name__ == "__main__":
    feature_dim = 32
    batch = 8
    key = jax.random.PRNGKey(0)
    kx, kp = jax.random.split(key)
    x = jax.random.normal(kx, (batch, feature_dim), jnp.float32)
    params = init_params(feature_dim, kp)

    checks = (("demographics", "small"), ("lab", "large"),
              ("diagnosis", "diagnosis"))

    # Per-modality dispatch path (matches the PyTorch module forward).
    for modality, _ in checks:
        out = jax.block_until_ready(unimodal_forward(params, x, modality))
        ref = reference_forward(params, x, modality)
        assert out.shape == (batch, NUM_LABELS), out.shape
        assert jnp.allclose(out, ref, atol=5e-4, rtol=5e-4), (
            f"mismatch for {modality}: max err {jnp.max(jnp.abs(out - ref))}")

    # Fused single-dispatch path (all three branch types at once).
    fused = unimodal_forward_fused(params, x)
    jax.block_until_ready(fused["diagnosis"])
    for modality, branch in checks:
        ref = reference_forward(params, x, modality)
        got = fused[branch]
        assert got.shape == (batch, NUM_LABELS), got.shape
        assert jnp.allclose(got, ref, atol=5e-4, rtol=5e-4), (
            f"fused mismatch for {modality}: max err "
            f"{jnp.max(jnp.abs(got - ref))}")

    print("KERNEL_OK")
</pallas_src>

<mosaic_0001>
module attributes {stable_mosaic.version = 11 : i64} {
  func.func @_mlp2_kernel(%arg0: memref<8x32xbf16, #tpu.memory_space<vmem>>, %arg1: memref<32x128xbf16, #tpu.memory_space<vmem>>, %arg2: memref<1x128xf32, #tpu.memory_space<vmem>>, %arg3: memref<1x128xf32, #tpu.memory_space<vmem>>, %arg4: memref<1x128xf32, #tpu.memory_space<vmem>>, %arg5: memref<128x128xbf16, #tpu.memory_space<vmem>>, %arg6: memref<1x128xf32, #tpu.memory_space<vmem>>, %arg7: memref<8x128xf32, #tpu.memory_space<vmem>>) attributes {dimension_semantics = [], scalar_prefetch = 0 : i64, scratch_operands = 0 : i64, tpu.core_type = #tpu.core_type<tc>} {
    %c0 = arith.constant 0 : index
    %c0_0 = arith.constant 0 : index
    %0 = vector.load %arg0[%c0, %c0_0] : memref<8x32xbf16, #tpu.memory_space<vmem>>, vector<8x32xbf16>
    %c0_1 = arith.constant 0 : index
    %c0_2 = arith.constant 0 : index
    %1 = vector.load %arg1[%c0_1, %c0_2] : memref<32x128xbf16, #tpu.memory_space<vmem>>, vector<32x128xbf16>
    %cst = arith.constant dense<0.000000e+00> : vector<8x128xf32>
    %2 = tpu.matmul %0, %1, %cst {dimension_numbers = #tpu.dot_dimension_numbers<[1], [0], [0], [1], [0, 0, 1, 1], [], []>} : vector<8x32xbf16>, vector<32x128xbf16>, vector<8x128xf32> -> vector<8x128xf32>
    %c0_3 = arith.constant 0 : index
    %c0_4 = arith.constant 0 : index
    %3 = vector.load %arg2[%c0_3, %c0_4] : memref<1x128xf32, #tpu.memory_space<vmem>>, vector<1x128xf32>
    %4 = vector.broadcast %3 : vector<1x128xf32> to vector<8x128xf32>
    %5 = arith.addf %2, %4 : vector<8x128xf32>
    %c0_5 = arith.constant 0 : index
    %c0_6 = arith.constant 0 : index
    %6 = vector.load %arg3[%c0_5, %c0_6] : memref<1x128xf32, #tpu.memory_space<vmem>>, vector<1x128xf32>
    %c0_7 = arith.constant 0 : index
    %c0_8 = arith.constant 0 : index
    %7 = vector.load %arg4[%c0_7, %c0_8] : memref<1x128xf32, #tpu.memory_space<vmem>>, vector<1x128xf32>
    %cst_9 = arith.constant dense<0.000000e+00> : vector<128xf32>
    %8 = vector.multi_reduction <add>, %5, %cst_9 [0] : vector<8x128xf32> to vector<128xf32>
    %9 = vector.shape_cast %8 : vector<128xf32> to vector<1x128xf32>
    %10 = arith.mulf %5, %5 : vector<8x128xf32>
    %cst_10 = arith.constant dense<0.000000e+00> : vector<128xf32>
    %11 = vector.multi_reduction <add>, %10, %cst_10 [0] : vector<8x128xf32> to vector<128xf32>
    %12 = vector.shape_cast %11 : vector<128xf32> to vector<1x128xf32>
    %cst_11 = arith.constant 1.250000e-01 : f32
    %13 = vector.broadcast %cst_11 : f32 to vector<1x128xf32>
    %14 = arith.mulf %9, %13 : vector<1x128xf32>
    %cst_12 = arith.constant 1.250000e-01 : f32
    %15 = vector.broadcast %cst_12 : f32 to vector<1x128xf32>
    %16 = arith.mulf %12, %15 : vector<1x128xf32>
    %17 = arith.mulf %14, %14 : vector<1x128xf32>
    %18 = arith.subf %16, %17 : vector<1x128xf32>
    %cst_13 = arith.constant 0.000000e+00 : f32
    %19 = vector.broadcast %cst_13 : f32 to vector<1x128xf32>
    %20 = arith.maximumf %18, %19 : vector<1x128xf32>
    %cst_14 = arith.constant 9.99999974E-6 : f32
    %21 = vector.broadcast %cst_14 : f32 to vector<1x128xf32>
    %22 = arith.addf %20, %21 : vector<1x128xf32>
    %23 = math.rsqrt %22 : vector<1x128xf32>
    %24 = arith.mulf %6, %23 : vector<1x128xf32>
    %25 = arith.mulf %14, %24 : vector<1x128xf32>
    %26 = arith.subf %7, %25 : vector<1x128xf32>
    %27 = vector.broadcast %24 : vector<1x128xf32> to vector<8x128xf32>
    %28 = arith.mulf %5, %27 : vector<8x128xf32>
    %29 = vector.broadcast %26 : vector<1x128xf32> to vector<8x128xf32>
    %30 = arith.addf %28, %29 : vector<8x128xf32>
    %cst_15 = arith.constant 0.000000e+00 : f32
    %31 = vector.broadcast %cst_15 : f32 to vector<8x128xf32>
    %32 = arith.maximumf %30, %31 : vector<8x128xf32>
    %33 = arith.truncf %32 : vector<8x128xf32> to vector<8x128xbf16>
    %c0_16 = arith.constant 0 : index
    %c0_17 = arith.constant 0 : index
    %34 = vector.load %arg5[%c0_16, %c0_17] : memref<128x128xbf16, #tpu.memory_space<vmem>>, vector<128x128xbf16>
    %cst_18 = arith.constant dense<0.000000e+00> : vector<8x128xf32>
    %35 = tpu.matmul %33, %34, %cst_18 {dimension_numbers = #tpu.dot_dimension_numbers<[1], [0], [0], [1], [0, 0, 1, 1], [], []>} : vector<8x128xbf16>, vector<128x128xbf16>, vector<8x128xf32> -> vector<8x128xf32>
    %c0_19 = arith.constant 0 : index
    %c0_20 = arith.constant 0 : index
    %36 = vector.load %arg6[%c0_19, %c0_20] : memref<1x128xf32, #tpu.memory_space<vmem>>, vector<1x128xf32>
    %37 = vector.broadcast %36 : vector<1x128xf32> to vector<8x128xf32>
    %38 = arith.addf %35, %37 : vector<8x128xf32>
    %c0_21 = arith.constant 0 : index
    %c0_22 = arith.constant 0 : index
    %39 = vector.load %arg7[%c0_21, %c0_22] : memref<8x128xf32, #tpu.memory_space<vmem>>, vector<8x128xf32>
    tpu.vector_store %arg7[%c0_21, %c0_22], %38 {strides = array<i32>} : memref<8x128xf32, #tpu.memory_space<vmem>>, vector<8x128xf32>,
    return
  }
}

</mosaic_0001>

<bundles_post_ra>
// kernel: tpu_custom_call.1
= control target key start
LH: loop header
LB: loop body
LE: loop exit
PB: predicated region body
PF: predicated region fallthrough
CT: control target
= control target key end

     0   :  { %12 = vsyncpa [#allocation3], 0  ;;  %s585_s0 = inlined_call_operand.hbm [shape: bf16[8,32], index: 0, kind: input, shape index: {}]   ;;  %s586_s1 = inlined_call_operand.hbm [shape: bf16[32,128], index: 1, kind: input, shape index: {}]   ;;  %s587_s2 = inlined_call_operand.vmem [shape: f32[1,128], index: 2, kind: input, shape index: {}]   ;;  %s588_s3 = inlined_call_operand.vmem [shape: f32[1,128], index: 3, kind: input, shape index: {}]   ;;  %s589_s4 = inlined_call_operand.vmem [shape: f32[1,128], index: 4, kind: input, shape index: {}]   ;;  %s590_s5 = inlined_call_operand.hbm [shape: bf16[128,128], index: 5, kind: input, shape index: {}]   ;;  %s591_s6 = inlined_call_operand.vmem [shape: f32[1,128], index: 6, kind: input, shape index: {}]   ;;  %s592_s7 = inlined_call_operand.hbm [shape: f32[8,128], index: 7, kind: output, shape index: {}]  }
   0x1   :  { %13 = vsyncpa [#allocation6], 0 }
   0x2   :  { %14 = vsyncpa [#allocation4], 0  ;;  %s471_s24 = smov [#allocation5]   ;;  %s377_s28 = scalar_lea.hbm %s586_s1, 256 }
   0x3   :  { %s30_s25 = sshll.u32 %s471_s24, 4  ;;  %p378_p0 = scmp.ne.s32.totalorder %s586_s1, %s377_s28  ;;  %s31_s25 = int_to_ptr.vmem [resolvable:$true] %s30_s25 }
   0x4   :  { %p381_p1 = scmp.lt.u32.totalorder %s377_s28, %s586_s1 }
   0x6   :  { %p383_p2 = pnand %p381_p1, %p378_p0 }
   0x8   :  { %386 = shalt.err (!%p383_p2)
}
   0x9   :  { %s387_s10 = scalar_lea.vmem %s31_s25, 256  ;;  %p392_p4 = scmp.lt.s32.totalorder %s31_s25, %s31_s25 }
   0xa   :  { %p388_p3 = scmp.ne.s32.totalorder %s31_s25, %s387_s10  ;;  %p393_p5 = scmp.lt.s32.totalorder %s387_s10, %s387_s10 }
   0xc   :  { %p394_p6 = por %p393_p5, %p392_p4 }
   0xe   :  { %p395_p7 = pnand %p394_p6, %p388_p3 }
  0x10   :  { %398 = shalt.err (!%p395_p7)
}
  0x11   :  { %s472_s11 = smov 64   ;;  %s473_s12 = smov 4  }
  0x12   :  { %36 = dma.hbm_to_vmem [thread:$0]  %s586_s1, 256, %s31_s25, [#allocation6], %s472_s11, %s472_s11, %s473_s12  }
  0x13   :  { %s474_s15 = smov [#allocation2]   ;;  %s475_s17 = smov [#allocation7]  }
  0x14   :  { %s21_s16 = sshll.u32 %s474_s15, 4  ;;  %s48_s18 = sshll.u32 %s475_s17, 4  ;;  %s22_s16 = int_to_ptr.vmem [resolvable:$true] %s21_s16  ;;  %s49_s18 = int_to_ptr.vmem [resolvable:$true] %s48_s18 }
  0x15   :  { %s399_s21 = scalar_lea.hbm %s585_s0, 64 }
  0x16   :  { %p400_p8 = scmp.ne.s32.totalorder %s585_s0, %s399_s21  ;;  %p403_p9 = scmp.lt.u32.totalorder %s399_s21, %s585_s0 }
  0x18   :  { %p405_p10 = pnand %p403_p9, %p400_p8 }
  0x1a   :  { %408 = shalt.err (!%p405_p10)
}
  0x1b   :  { %s409_s1 = scalar_lea.vmem %s22_s16, 64  ;;  %p414_p12 = scmp.lt.s32.totalorder %s22_s16, %s22_s16 }
  0x1c   :  { %p410_p11 = scmp.ne.s32.totalorder %s22_s16, %s409_s1  ;;  %p415_p13 = scmp.lt.s32.totalorder %s409_s1, %s409_s1 }
  0x1e   :  { %p416_p0 = por %p415_p13, %p414_p12 }
  0x20   :  { %p417_p1 = pnand %p416_p0, %p410_p11 }
  0x22   :  { %420 = shalt.err (!%p417_p1)
}
  0x23   :  { %24 = dma.hbm_to_vmem [thread:$0]  %s585_s0, 64, %s22_s16, [#allocation3]  }
  0x24   :  { %s421_s30 = scalar_lea.hbm %s590_s5, 1024 }
  0x25   :  { %p422_p2 = scmp.ne.s32.totalorder %s590_s5, %s421_s30  ;;  %p425_p3 = scmp.lt.u32.totalorder %s421_s30, %s590_s5 }
  0x27   :  { %p427_p4 = pnand %p425_p3, %p422_p2 }
  0x29   :  { %430 = shalt.err (!%p427_p4)
}
  0x2a   :  { %s431_s14 = scalar_lea.vmem %s49_s18, 1024  ;;  %p436_p6 = scmp.lt.s32.totalorder %s49_s18, %s49_s18 }
  0x2b   :  { %p432_p5 = scmp.ne.s32.totalorder %s49_s18, %s431_s14  ;;  %p437_p7 = scmp.lt.s32.totalorder %s431_s14, %s431_s14 }
  0x2d   :  { %p438_p8 = por %p437_p7, %p436_p6 }
  0x2f   :  { %p439_p9 = pnand %p438_p8, %p432_p5 }
  0x31   :  { %442 = shalt.err (!%p439_p9)
}
  0x32   :  { %54 = dma.hbm_to_vmem [thread:$0]  %s590_s5, 1024, %s49_s18, [#allocation6], %s472_s11, %s472_s11, %s473_s12  }
  0x33   :  { %465 = dma.done.wait [#allocation3], 64  }
  0x34   :  { %466 = vsyncadd [#allocation3], 4294967232 }
  0x35   :  { %467 = dma.done.wait [#allocation6], 1280  }
  0x36   :  { %468 = vsyncadd [#allocation6], 4294966016  ;;  %v476_v0 = vmov 0.0   ;;  %vm477_vm0 = vmmov 0   ;;  %v365_v1 = vld [vmem:[#allocation5] sm:$0xff]   ;;  %v366_v2 = vld [vmem:[#allocation5 + $0x8] sm:$0xff]   ;;  %v161_v37 = vlaneseq }
  0x37   :  { %329 = vmatprep.subr.bf16.mxu0 %v476_v0  ;;  %333 = vmatprep.mubr.msk.bf16.mxu0 %vm477_vm0, %v476_v0  ;;  %vm91_vm1 = vcmask 261120   ;;  %v67_v3 = vld [vmem:[#allocation2] sm:$0xf]  ;;  %v367_v4 = vld [vmem:[#allocation7] sm:$0xff]   ;;  %v369_v6 = vld [vmem:[#allocation7 + $0x10] sm:$0xff]  }
  0x38   :  { %337 = vmatprep.subr.bf16.mxu1 %v476_v0  ;;  %353 = vmatprep.mubr.msk.bf16.mxu1 %vm477_vm0, %v476_v0  ;;  %v368_v5 = vld [vmem:[#allocation7 + $0x8] sm:$0xff]   ;;  %v370_v7 = vld [vmem:[#allocation7 + $0x18] sm:$0xff]   ;;  %v371_v8 = vld [vmem:[#allocation7 + $0x20] sm:$0xff]   ;;  %v162_v38 = vshrl.u32 %v161_v37, 7 }
  0x39   :  { %330 = vmatpush3.bf16.msra.mxu0 %v365_v1  ;;  %338 = vmatpush3.bf16.msra.mxu1 %v367_v4  ;;  %v372_v9 = vld [vmem:[#allocation7 + $0x28] sm:$0xff]   ;;  %v373_v10 = vld [vmem:[#allocation7 + $0x30] sm:$0xff]   ;;  %v374_v11 = vld [vmem:[#allocation7 + $0x38] sm:$0xff]  }
  0x3a   :  { %331 = vmatprep.subr.bf16.mxu0 %v476_v0  ;;  %339 = vmatprep.subr.bf16.mxu1 %v476_v0  ;;  %v304_v12 = vld [vmem:[%s587_s2] ss:$0 sm:$0xff]  ;;  %v163_v40 = vsub.s32 0, %v162_v38 }
  0x3b   :  { %v135_v39 = vld [vmem:[%s588_s3] sm:$0x1]  ;;  %s478_s3 = smov [#allocation8]  }
  0x3c   :  { %v136_v43 = vld [vmem:[%s589_s4] sm:$0x1]  ;;  %s294_s20 = sshll.u32 %s478_s3, 4  ;;  %s295_s20 = int_to_ptr.vmem [resolvable:$true] %s294_s20 }
  0x3d   :  { %332 = vmatpush3.bf16.msra.mxu0 %v366_v2  ;;  %340 = vmatpush3.bf16.msra.mxu1 %v368_v5  ;;  %v308_v52 = vld [vmem:[%s591_s6] ss:$0 sm:$0xff]  ;;  %s443_s4 = scalar_lea.vmem %s295_s20, 128  ;;  %p448_p11 = scmp.lt.s32.totalorder %s295_s20, %s295_s20 }
  0x3e   :  { %341 = vmatprep.subr.bf16.mxu1 %v476_v0  ;;  %p444_p10 = scmp.ne.s32.totalorder %s295_s20, %s443_s4  ;;  %p449_p12 = scmp.lt.s32.totalorder %s443_s4, %s443_s4 }
  0x40   :  { %334 = vmatmul.mubr.msk.bf16.vlgmr.msra.gmra.mrb[0].mxu0 %vm91_vm1, %v67_v3  ;;  %p450_p13 = por %p449_p12, %p448_p11 }
  0x41   :  { %342 = vmatpush3.bf16.msra.mxu1 %v369_v6 }
  0x42   :  { %343 = vmatprep.subr.bf16.mxu1 %v476_v0  ;;  %p451_p0 = pnand %p450_p13, %p444_p10 }
  0x45   :  { %344 = vmatpush3.bf16.msra.mxu1 %v370_v7 }
  0x46   :  { %345 = vmatprep.subr.bf16.mxu1 %v476_v0 }
  0x49   :  { %346 = vmatpush3.bf16.msra.mxu1 %v371_v8 }
  0x4a   :  { %347 = vmatprep.subr.bf16.mxu1 %v476_v0 }
  0x4d   :  { %348 = vmatpush3.bf16.msra.mxu1 %v372_v9 }
  0x4e   :  { %349 = vmatprep.subr.bf16.mxu1 %v476_v0 }
  0x51   :  { %350 = vmatpush3.bf16.msra.mxu1 %v373_v10 }
  0x52   :  { %351 = vmatprep.subr.bf16.mxu1 %v476_v0 }
  0x55   :  { %352 = vmatpush3.bf16.msra.mxu1 %v374_v11 }
 0x113   :  { %v129_v13 = vpop.f32.mrb[0].mxu0 }
 0x114   :  { %v130_v14 = vadd.f32 %v304_v12, %v129_v13  ;;  %v335_v15 = vpop.f32.mrb[1].mxu0 }
 0x115   :  { %v132_v16 = vpop.f32.mrb[2].mxu0 }
 0x116   :  { %v137_v17 = vrot.slane %v130_v14, 4  ;;  %v143_v18 = vmul.f32 %v130_v14, %v130_v14  ;;  %v336_v19 = vpop.f32.mrb[3].mxu0 }
 0x118   :  { %v138_v20 = vadd.f32 %v137_v17, %v130_v14  ;;  %v144_v21 = vrot.slane %v143_v18, 4 }
 0x11a   :  { %v139_v22 = vrot.slane %v138_v20, 2  ;;  %v145_v23 = vadd.f32 %v144_v21, %v143_v18 }
 0x11c   :  { %v140_v24 = vadd.f32 %v139_v22, %v138_v20  ;;  %v146_v25 = vrot.slane %v145_v23, 2 }
 0x11e   :  { %v141_v26 = vrot.slane %v140_v24, 1  ;;  %v147_v27 = vadd.f32 %v146_v25, %v145_v23 }
 0x120   :  { %v142_v28 = vadd.f32 %v141_v26, %v140_v24  ;;  %v148_v29 = vrot.slane %v147_v27, 1 }
 0x122   :  { %v149_v30 = vadd.f32 %v148_v29, %v147_v27  ;;  %v150_v31 = vmul.f32 0.125, %v142_v28 }
 0x124   :  { %v151_v32 = vmul.f32 0.125, %v149_v30  ;;  %v152_v33 = vmul.f32 %v150_v31, %v150_v31 }
 0x126   :  { %v153_v34 = vsub.f32 %v151_v32, %v152_v33 }
 0x128   :  { %v154_v35 = vmax.f32 %v153_v34, 0.0 }
 0x12a   :  { %v155_v36 = vadd.f32 1e-05, %v154_v35 }
 0x12c   :  { %375 = vrsqrt.f32 %v155_v36 }
 0x136   :  { %v376_v41 = vpop.eup %375 }
 0x137   :  { %v157_v42 = vmul.f32 %v376_v41, %v135_v39 }
 0x139   :  { %v158_v44 = vmul.f32 %v157_v42, %v150_v31  ;;  %v164_v45 = vrot.slane %v157_v42, %v163_v40 }
 0x13b   :  { %v159_v46 = vsub.f32 %v136_v43, %v158_v44  ;;  %v166_v47 = vmul.f32 %v164_v45, %v130_v14 }
 0x13d   :  { %v171_v48 = vrot.slane %v159_v46, %v163_v40 }
 0x13f   :  { %v173_v49 = vadd.f32 %v171_v48, %v166_v47 }
 0x141   :  { %v174_v50 = vmax.f32 %v173_v49, 0.0 }
 0x143   :  { %v175_v51 = vpack.c.bf16 %v174_v50, %v174_v50 }
 0x145   :  { %354 = vmatmul.mubr.bf16.vlgmr.msra.gmra.mrb[0].mxu1 %v175_v51 }
 0x218   :  { %v281_v53 = vpop.f32.mrb[0].mxu1 }
 0x219   :  { %v282_v54 = vadd.f32 %v308_v52, %v281_v53  ;;  %v355_v55 = vpop.f32.mrb[1].mxu1 }
 0x21a   :  { %v284_v56 = vpop.f32.mrb[2].mxu1 }
 0x21b   :  { %287 = vst [vmem:[#allocation8] sm:$0xff] %v282_v54  ;;  %v356_v57 = vpop.f32.mrb[3].mxu1 }
 0x21c   :  { %454 = shalt.err (!%p451_p0)
}
 0x21d   :  { %s455_s6 = scalar_lea.hbm %s592_s7, 128 }
 0x21e   :  { %p456_p1 = scmp.ne.s32.totalorder %s592_s7, %s455_s6  ;;  %p459_p2 = scmp.lt.u32.totalorder %s455_s6, %s592_s7 }
 0x220   :  { %p461_p3 = pnand %p459_p2, %p456_p1 }
 0x222   :  { %464 = shalt.err (!%p461_p3)
}
 0x223   :  { %297 = dma.vmem_to_hbm [thread:$0]  %s295_s20, 128, %s592_s7, [#allocation4]  }
 0x224   :  { %469 = dma.done.wait [#allocation4], 128  }
 0x225   :  { %470 = vsyncadd [#allocation4], 4294967168 }
 0x226   :  { %301 = vsyncpa [#allocation3], 1 }
 0x227   :  { %302 = vsyncpa [#allocation6], 1 }
 0x228   :  { %303 = vsyncpa [#allocation4], 1 }

</bundles_post_ra>
